<compile_context>
chip_gen: v7x
topology: tpu7x:2x2x1
jax: 0.10.0
libtpu: 0.0.40
codegen_flags: <defaults>
</compile_context>

<pallas_src>
import functools

import jax
import jax.numpy as jnp
from jax.experimental import pallas as pl
from jax.experimental.pallas import tpu as pltpu


def mhfa_pool_kernel(x_ref, wkv_ref, bkv_ref, wa_ref, ba_ref,
                     pooled_ref, m_sc, l_sc, acc_sc,
                     *, total_t, t_tile, cmp_dim):
    """One (batch, time-tile) grid step.

    x_ref     : (1, Tt, L*D) bf16      -- current time tile of one batch elem
    wkv_ref   : (L*D, 2C)    bf16      -- fused layer-mix + k/v compression
    bkv_ref   : (1, 2C)      f32
    wa_ref    : (C, H)       f32
    ba_ref    : (1, H)       f32
    pooled_ref: (1, C, H)    f32 out   -- resident across the time-tile axis
    m_sc,l_sc : (1, H)       f32 scratch (running max / running sum per head)
    acc_sc    : (C, H)       f32 scratch (un-normalized pooled accumulator)
    """
    t_idx = pl.program_id(1)

    @pl.when(t_idx == 0)
    def _init():
        m_sc[...] = jnp.full_like(m_sc, -1e30)
        l_sc[...] = jnp.zeros_like(l_sc)
        acc_sc[...] = jnp.zeros_like(acc_sc)

    x = x_ref[0]                                                      # (Tt, L*D) bf16

    # Fused layer-mix + k/v compression: one wide bf16 MXU matmul, f32 accum.
    kv = jnp.dot(x, wkv_ref[...],
                 preferred_element_type=jnp.float32) + bkv_ref[...]   # (Tt, 2C) f32
    k = kv[:, :cmp_dim]                                               # (Tt, C)
    v = kv[:, cmp_dim:]                                               # (Tt, C)

    # Per-head attention logits.
    s = jnp.dot(k, wa_ref[...],
                preferred_element_type=jnp.float32) + ba_ref[...]     # (Tt, H)

    # Mask padded rows of a ragged last tile (statically absent when T % Tt == 0).
    if total_t % t_tile != 0:
        t0 = t_idx * t_tile
        row_h = jax.lax.broadcasted_iota(jnp.int32, s.shape, 0)
        s = jnp.where(t0 + row_h < total_t, s, -1e30)
        row_c = jax.lax.broadcasted_iota(jnp.int32, v.shape, 0)
        v = jnp.where(t0 + row_c < total_t, v, 0.0)

    # Online softmax over time (per head), f32 statistics.
    m_prev = m_sc[...]                                                # (1, H)
    m_new = jnp.maximum(m_prev, jnp.max(s, axis=0, keepdims=True))    # (1, H)
    alpha = jnp.exp(m_prev - m_new)                                   # (1, H)
    p = jnp.exp(s - m_new)                                            # (Tt, H)
    l_sc[...] = alpha * l_sc[...] + jnp.sum(p, axis=0, keepdims=True)
    # acc[c, h] += sum_t v[t, c] * p[t, h]   (small MXU matmul, f32 accum)
    acc_sc[...] = alpha * acc_sc[...] + jax.lax.dot_general(
        v, p, (((0,), (0,)), ((), ())), preferred_element_type=jnp.float32)
    m_sc[...] = m_new

    @pl.when(t_idx == pl.num_programs(1) - 1)
    def _finalize():
        inv_l = pl.reciprocal(l_sc[...], approx=True)                 # (1, H)
        pooled_ref[0] = (acc_sc[...] * inv_l).astype(pooled_ref.dtype)


def mhfa_forward(x_btld, params, *, time_tile=128):
    """MHFA forward on x in kernel-native (B, T, L, D) layout."""
    B, T, L, D = x_btld.shape
    C = params["Wk"].shape[1]
    H = params["Wa"].shape[1]
    O = params["Wp"].shape[1]
    LD = L * D
    f32 = jnp.float32

    # ---- time-axis tiling (bf16-sublane friendly) ----
    Tt = min(time_tile, T)
    if Tt < T and Tt % 16 != 0:
        Tt = max(16, (Tt // 16) * 16)
    nt = pl.cdiv(T, Tt)

    # ---- one-time weight prep (tiny, done in XLA) ----
    swk = jax.nn.softmax(params["weights_k"].astype(f32), axis=-1)    # (L,)
    swv = jax.nn.softmax(params["weights_v"].astype(f32), axis=-1)
    wk_f = (swk[:, None, None] * params["Wk"].astype(f32)[None]).reshape(LD, C)
    wv_f = (swv[:, None, None] * params["Wv"].astype(f32)[None]).reshape(LD, C)
    wkv = jnp.concatenate([wk_f, wv_f], axis=1).astype(jnp.bfloat16)  # (LD, 2C)
    bkv = jnp.concatenate([params["bk"], params["bv"]]).reshape(1, 2 * C).astype(f32)
    wa = params["Wa"].astype(f32)                                     # (C, H)
    ba = params["ba"].reshape(1, H).astype(f32)

    # bf16 stream + free contiguous-minor reshape (B, T, L, D) -> (B, T, L*D).
    x_flat = x_btld.astype(jnp.bfloat16).reshape(B, T, LD)

    # ---- scoped-VMEM budget: double-buffered x tile / weights / out + scratch ----
    x_tile_b = Tt * LD * 2
    w_b = LD * 2 * C * 2 + (2 * C + C * H + H) * 4
    out_b = C * H * 4
    scr_b = (2 * H + C * H) * 4
    vmem_limit = int(2 * (x_tile_b + w_b + out_b) + scr_b + (8 << 20))
    vmem_limit = max(min(vmem_limit, 100 << 20), 16 << 20)

    kern = functools.partial(mhfa_pool_kernel, total_t=T, t_tile=Tt, cmp_dim=C)

    pooled = pl.pallas_call(
        kern,
        out_shape=jax.ShapeDtypeStruct((B, C, H), jnp.float32),
        grid_spec=pltpu.PrefetchScalarGridSpec(
            num_scalar_prefetch=0,
            grid=(B, nt),
            in_specs=[
                pl.BlockSpec((1, Tt, LD), lambda b, t: (b, t, 0)),    # x stream
                pl.BlockSpec((LD, 2 * C), lambda b, t: (0, 0)),       # fused Wkv
                pl.BlockSpec((1, 2 * C), lambda b, t: (0, 0)),        # fused bkv
                pl.BlockSpec((C, H), lambda b, t: (0, 0)),            # Wa
                pl.BlockSpec((1, H), lambda b, t: (0, 0)),            # ba
            ],
            out_specs=pl.BlockSpec((1, C, H), lambda b, t: (b, 0, 0)),
            scratch_shapes=[
                pltpu.VMEM((1, H), jnp.float32),   # running max
                pltpu.VMEM((1, H), jnp.float32),   # running sum
                pltpu.VMEM((C, H), jnp.float32),   # pooled accumulator
            ],
        ),
        compiler_params=pltpu.CompilerParams(
            dimension_semantics=("parallel", "arbitrary"),
            vmem_limit_bytes=vmem_limit,
        ),
    )(x_flat, wkv, bkv, wa, ba)

    # Final projection: one batched lane-dense GEMM in XLA.  Wp rows permuted
    # once so the kernel's (c*H + h) flatten matches PyTorch's (h*C + c).
    wp_perm = params["Wp"].astype(f32).reshape(H, C, O).transpose(1, 0, 2).reshape(C * H, O)
    out = pooled.reshape(B, C * H) @ wp_perm + params["bp"].astype(f32).reshape(1, O)
    return out


def mhfa_forward_torch_layout(x_bdtl, params, *, time_tile=128):
    """Strict drop-in: x in the PyTorch module's (B, D, T, L) layout."""
    return mhfa_forward(jnp.transpose(x_bdtl, (0, 2, 3, 1)), params,
                        time_tile=time_tile)


def mhfa_reference(x_bdtl, p):
    """Pure-JAX mirror of the PyTorch forward; x_bdtl: (B, D, T, L) float32."""
    sk = jax.nn.softmax(p["weights_k"], axis=-1)
    sv = jax.nn.softmax(p["weights_v"], axis=-1)
    k = jnp.sum(x_bdtl * sk, axis=-1).transpose(0, 2, 1)   # (B, T, D)
    v = jnp.sum(x_bdtl * sv, axis=-1).transpose(0, 2, 1)   # (B, T, D)
    k = k @ p["Wk"] + p["bk"]
    v = v @ p["Wv"] + p["bv"]
    att = jax.nn.softmax(k @ p["Wa"] + p["ba"], axis=1)    # softmax over time
    pooled = jnp.einsum("bth,btc->bhc", att, v)            # (B, H, C)
    return pooled.reshape(x_bdtl.shape[0], -1) @ p["Wp"] + p["bp"]


if __name__ == "__main__":
    # Small shapes consistent with the module: 25 layers fixed, head_nb=8,
    # small D/C/O, T=24 with time_tile=16 so the online softmax runs over two
    # tiles and exercises the ragged-tile masking path.
    B, D, T, L = 2, 32, 24, 25
    H, C, O = 8, 16, 8

    key = jax.random.PRNGKey(0)
    ks = jax.random.split(key, 8)

    # Kernel-native layout (B, T, L, D); quantize to bf16-representable values
    # once so the bf16 kernel and the f32 reference consume identical inputs.
    x_btld = jax.random.normal(ks[0], (B, T, L, D), jnp.float32)
    x_btld = x_btld.astype(jnp.bfloat16).astype(jnp.float32)
    x_bdtl = jnp.transpose(x_btld, (0, 3, 1, 2))   # reference-only (B, D, T, L) view

    params = dict(
        weights_k=jnp.ones((L,), jnp.float32),     # as in the module __init__
        weights_v=jnp.ones((L,), jnp.float32),
        Wk=0.1 * jax.random.normal(ks[1], (D, C), jnp.float32),
        bk=0.01 * jax.random.normal(ks[2], (C,), jnp.float32),
        Wv=0.1 * jax.random.normal(ks[3], (D, C), jnp.float32),
        bv=0.01 * jax.random.normal(ks[4], (C,), jnp.float32),
        Wa=0.1 * jax.random.normal(ks[5], (C, H), jnp.float32),
        ba=jnp.zeros((H,), jnp.float32),
        Wp=0.1 * jax.random.normal(ks[6], (H * C, O), jnp.float32),
        bp=0.01 * jax.random.normal(ks[7], (O,), jnp.float32),
    )

    out = jax.block_until_ready(mhfa_forward(x_btld, params, time_tile=16))
    ref = mhfa_reference(x_bdtl, params)

    assert out.shape == (B, O), out.shape
    err = float(jnp.max(jnp.abs(out - ref)))
    assert jnp.allclose(out, ref, atol=2e-2, rtol=2e-2), ("mismatch", err)
    print("KERNEL_OK")
</pallas_src>

<mosaic_0001>
module attributes {stable_mosaic.version = 11 : i64} {
  func.func @mhfa_pool_kernel(%arg0: i32, %arg1: i32, %arg2: memref<1x16x800xbf16, #tpu.memory_space<vmem>>, %arg3: memref<800x32xbf16, #tpu.memory_space<vmem>>, %arg4: memref<1x32xf32, #tpu.memory_space<vmem>>, %arg5: memref<16x8xf32, #tpu.memory_space<vmem>>, %arg6: memref<1x8xf32, #tpu.memory_space<vmem>>, %arg7: memref<1x16x8xf32, #tpu.memory_space<vmem>>, %arg8: memref<1x8xf32, #tpu.memory_space<vmem>>, %arg9: memref<1x8xf32, #tpu.memory_space<vmem>>, %arg10: memref<16x8xf32, #tpu.memory_space<vmem>>) attributes {dimension_semantics = [#tpu.dimension_semantics<parallel>, #tpu.dimension_semantics<arbitrary>], iteration_bounds = array<i64: 2, 2>, scalar_prefetch = 0 : i64, scratch_operands = 3 : i64, tpu.core_type = #tpu.core_type<tc>, window_params = [{transform_indices = @transform_0, window_bounds = array<i64: 1, 16, 800>}, {pipeline_mode = #tpu.pipeline_mode<synchronous>, transform_indices = @transform_1, window_bounds = array<i64: 800, 32>}, {pipeline_mode = #tpu.pipeline_mode<synchronous>, transform_indices = @transform_2, window_bounds = array<i64: 1, 32>}, {pipeline_mode = #tpu.pipeline_mode<synchronous>, transform_indices = @transform_3, window_bounds = array<i64: 16, 8>}, {pipeline_mode = #tpu.pipeline_mode<synchronous>, transform_indices = @transform_4, window_bounds = array<i64: 1, 8>}, {transform_indices = @transform_5, window_bounds = array<i64: 1, 16, 8>}]} {
    %c0_i32 = arith.constant 0 : i32
    %0 = arith.cmpi eq, %arg1, %c0_i32 : i32
    %1 = arith.extui %0 : i1 to i32
    %c0_i32_0 = arith.constant 0 : i32
    %2 = arith.cmpi ne, %1, %c0_i32_0 : i32
    scf.if %2 {
      %cst_31 = arith.constant -1.000000e+30 : f32
      %57 = vector.broadcast %cst_31 : f32 to vector<1x8xf32>
      %c0_32 = arith.constant 0 : index
      %c0_33 = arith.constant 0 : index
      %58 = vector.load %arg8[%c0_32, %c0_33] : memref<1x8xf32, #tpu.memory_space<vmem>>, vector<1x8xf32>
      tpu.vector_store %arg8[%c0_32, %c0_33], %57 {strides = array<i32>} : memref<1x8xf32, #tpu.memory_space<vmem>>, vector<1x8xf32>,
      %cst_34 = arith.constant 0.000000e+00 : f32
      %59 = vector.broadcast %cst_34 : f32 to vector<1x8xf32>
      %c0_35 = arith.constant 0 : index
      %c0_36 = arith.constant 0 : index
      %60 = vector.load %arg9[%c0_35, %c0_36] : memref<1x8xf32, #tpu.memory_space<vmem>>, vector<1x8xf32>
      tpu.vector_store %arg9[%c0_35, %c0_36], %59 {strides = array<i32>} : memref<1x8xf32, #tpu.memory_space<vmem>>, vector<1x8xf32>,
      %cst_37 = arith.constant 0.000000e+00 : f32
      %61 = vector.broadcast %cst_37 : f32 to vector<16x8xf32>
      %c0_38 = arith.constant 0 : index
      %c0_39 = arith.constant 0 : index
      %62 = vector.load %arg10[%c0_38, %c0_39] : memref<16x8xf32, #tpu.memory_space<vmem>>, vector<16x8xf32>
      tpu.vector_store %arg10[%c0_38, %c0_39], %61 {strides = array<i32>} : memref<16x8xf32, #tpu.memory_space<vmem>>, vector<16x8xf32>,
    } else {
    }
    %c0 = arith.constant 0 : index
    %c0_1 = arith.constant 0 : index
    %c0_2 = arith.constant 0 : index
    %3 = vector.load %arg2[%c0, %c0_1, %c0_2] : memref<1x16x800xbf16, #tpu.memory_space<vmem>>, vector<1x16x800xbf16>
    %4 = vector.shape_cast %3 : vector<1x16x800xbf16> to vector<16x800xbf16>
    %c0_3 = arith.constant 0 : index
    %c0_4 = arith.constant 0 : index
    %5 = vector.load %arg3[%c0_3, %c0_4] : memref<800x32xbf16, #tpu.memory_space<vmem>>, vector<800x32xbf16>
    %cst = arith.constant dense<0.000000e+00> : vector<16x32xf32>
    %6 = tpu.matmul %4, %5, %cst {dimension_numbers = #tpu.dot_dimension_numbers<[1], [0], [0], [1], [0, 0, 1, 1], [], []>} : vector<16x800xbf16>, vector<800x32xbf16>, vector<16x32xf32> -> vector<16x32xf32>
    %c0_5 = arith.constant 0 : index
    %c0_6 = arith.constant 0 : index
    %7 = vector.load %arg4[%c0_5, %c0_6] : memref<1x32xf32, #tpu.memory_space<vmem>>, vector<1x32xf32>
    %8 = vector.broadcast %7 : vector<1x32xf32> to vector<16x32xf32>
    %9 = arith.addf %6, %8 : vector<16x32xf32>
    %10 = vector.extract_strided_slice %9 {offsets = [0, 0], sizes = [16, 16], strides = [1, 1]} : vector<16x32xf32> to vector<16x16xf32>
    %11 = vector.extract_strided_slice %9 {offsets = [0, 16], sizes = [16, 16], strides = [1, 1]} : vector<16x32xf32> to vector<16x16xf32>
    %c0_7 = arith.constant 0 : index
    %c0_8 = arith.constant 0 : index
    %12 = vector.load %arg5[%c0_7, %c0_8] : memref<16x8xf32, #tpu.memory_space<vmem>>, vector<16x8xf32>
    %cst_9 = arith.constant dense<0.000000e+00> : vector<16x8xf32>
    %13 = tpu.matmul %10, %12, %cst_9 {dimension_numbers = #tpu.dot_dimension_numbers<[1], [0], [0], [1], [0, 0, 1, 1], [], []>} : vector<16x16xf32>, vector<16x8xf32>, vector<16x8xf32> -> vector<16x8xf32>
    %c0_10 = arith.constant 0 : index
    %c0_11 = arith.constant 0 : index
    %14 = vector.load %arg6[%c0_10, %c0_11] : memref<1x8xf32, #tpu.memory_space<vmem>>, vector<1x8xf32>
    %15 = vector.broadcast %14 : vector<1x8xf32> to vector<16x8xf32>
    %16 = arith.addf %13, %15 : vector<16x8xf32>
    %c16_i32 = arith.constant 16 : i32
    %17 = arith.muli %arg1, %c16_i32 : i32
    %18 = tpu.iota {dimensions = array<i32: 0>} : vector<16x8xi32>
    %19 = vector.broadcast %17 : i32 to vector<16x8xi32>
    %20 = arith.addi %19, %18 : vector<16x8xi32>
    %c24_i32 = arith.constant 24 : i32
    %21 = vector.broadcast %c24_i32 : i32 to vector<16x8xi32>
    %22 = arith.cmpi slt, %20, %21 : vector<16x8xi32>
    %cst_12 = arith.constant -1.000000e+30 : f32
    %23 = vector.broadcast %cst_12 : f32 to vector<16x8xf32>
    %24 = arith.select %22, %16, %23 : vector<16x8xi1>, vector<16x8xf32>
    %25 = tpu.iota {dimensions = array<i32: 0>} : vector<16x16xi32>
    %26 = vector.broadcast %17 : i32 to vector<16x16xi32>
    %27 = arith.addi %26, %25 : vector<16x16xi32>
    %c24_i32_13 = arith.constant 24 : i32
    %28 = vector.broadcast %c24_i32_13 : i32 to vector<16x16xi32>
    %29 = arith.cmpi slt, %27, %28 : vector<16x16xi32>
    %cst_14 = arith.constant 0.000000e+00 : f32
    %30 = vector.broadcast %cst_14 : f32 to vector<16x16xf32>
    %31 = arith.select %29, %11, %30 : vector<16x16xi1>, vector<16x16xf32>
    %c0_15 = arith.constant 0 : index
    %c0_16 = arith.constant 0 : index
    %32 = vector.load %arg8[%c0_15, %c0_16] : memref<1x8xf32, #tpu.memory_space<vmem>>, vector<1x8xf32>
    %cst_17 = arith.constant dense<0xFF800000> : vector<8xf32>
    %33 = vector.multi_reduction <maximumf>, %24, %cst_17 [0] : vector<16x8xf32> to vector<8xf32>
    %34 = vector.shape_cast %33 : vector<8xf32> to vector<1x8xf32>
    %35 = arith.maximumf %32, %34 : vector<1x8xf32>
    %36 = arith.subf %32, %35 : vector<1x8xf32>
    %37 = math.exp %36 : vector<1x8xf32>
    %38 = vector.broadcast %35 : vector<1x8xf32> to vector<16x8xf32>
    %39 = arith.subf %24, %38 : vector<16x8xf32>
    %40 = math.exp %39 : vector<16x8xf32>
    %c0_18 = arith.constant 0 : index
    %c0_19 = arith.constant 0 : index
    %41 = vector.load %arg9[%c0_18, %c0_19] : memref<1x8xf32, #tpu.memory_space<vmem>>, vector<1x8xf32>
    %42 = arith.mulf %37, %41 : vector<1x8xf32>
    %cst_20 = arith.constant dense<0.000000e+00> : vector<8xf32>
    %43 = vector.multi_reduction <add>, %40, %cst_20 [0] : vector<16x8xf32> to vector<8xf32>
    %44 = vector.shape_cast %43 : vector<8xf32> to vector<1x8xf32>
    %45 = arith.addf %42, %44 : vector<1x8xf32>
    %c0_21 = arith.constant 0 : index
    %c0_22 = arith.constant 0 : index
    %46 = vector.load %arg9[%c0_21, %c0_22] : memref<1x8xf32, #tpu.memory_space<vmem>>, vector<1x8xf32>
    tpu.vector_store %arg9[%c0_21, %c0_22], %45 {strides = array<i32>} : memref<1x8xf32, #tpu.memory_space<vmem>>, vector<1x8xf32>,
    %c0_23 = arith.constant 0 : index
    %c0_24 = arith.constant 0 : index
    %47 = vector.load %arg10[%c0_23, %c0_24] : memref<16x8xf32, #tpu.memory_space<vmem>>, vector<16x8xf32>
    %48 = vector.broadcast %37 : vector<1x8xf32> to vector<16x8xf32>
    %49 = arith.mulf %48, %47 : vector<16x8xf32>
    %cst_25 = arith.constant dense<0.000000e+00> : vector<16x8xf32>
    %50 = tpu.matmul %31, %40, %cst_25 {dimension_numbers = #tpu.dot_dimension_numbers<[0], [0], [1], [1], [0, 1, 1, 1], [], []>} : vector<16x16xf32>, vector<16x8xf32>, vector<16x8xf32> -> vector<16x8xf32>
    %51 = arith.addf %49, %50 : vector<16x8xf32>
    %c0_26 = arith.constant 0 : index
    %c0_27 = arith.constant 0 : index
    %52 = vector.load %arg10[%c0_26, %c0_27] : memref<16x8xf32, #tpu.memory_space<vmem>>, vector<16x8xf32>
    tpu.vector_store %arg10[%c0_26, %c0_27], %51 {strides = array<i32>} : memref<16x8xf32, #tpu.memory_space<vmem>>, vector<16x8xf32>,
    %c0_28 = arith.constant 0 : index
    %c0_29 = arith.constant 0 : index
    %53 = vector.load %arg8[%c0_28, %c0_29] : memref<1x8xf32, #tpu.memory_space<vmem>>, vector<1x8xf32>
    tpu.vector_store %arg8[%c0_28, %c0_29], %35 {strides = array<i32>} : memref<1x8xf32, #tpu.memory_space<vmem>>, vector<1x8xf32>,
    %c1_i32 = arith.constant 1 : i32
    %54 = arith.cmpi eq, %arg1, %c1_i32 : i32
    %55 = arith.extui %54 : i1 to i32
    %c0_i32_30 = arith.constant 0 : i32
    %56 = arith.cmpi ne, %55, %c0_i32_30 : i32
    scf.if %56 {
      %c0_31 = arith.constant 0 : index
      %c0_32 = arith.constant 0 : index
      %57 = vector.load %arg9[%c0_31, %c0_32] : memref<1x8xf32, #tpu.memory_space<vmem>>, vector<1x8xf32>
      %58 = tpu.reciprocal %57 {approx = true} : vector<1x8xf32> -> vector<1x8xf32>
      %c0_33 = arith.constant 0 : index
      %c0_34 = arith.constant 0 : index
      %59 = vector.load %arg10[%c0_33, %c0_34] : memref<16x8xf32, #tpu.memory_space<vmem>>, vector<16x8xf32>
      %60 = vector.broadcast %58 : vector<1x8xf32> to vector<16x8xf32>
      %61 = arith.mulf %59, %60 : vector<16x8xf32>
      %c0_35 = arith.constant 0 : index
      %c0_36 = arith.constant 0 : index
      %c0_37 = arith.constant 0 : index
      %62 = vector.load %arg7[%c0_35, %c0_36, %c0_37] : memref<1x16x8xf32, #tpu.memory_space<vmem>>, vector<1x16x8xf32>
      %63 = vector.shape_cast %62 : vector<1x16x8xf32> to vector<16x8xf32>
      %64 = vector.shape_cast %61 : vector<16x8xf32> to vector<1x16x8xf32>
      tpu.vector_store %arg7[%c0_35, %c0_36, %c0_37], %64 {strides = array<i32>} : memref<1x16x8xf32, #tpu.memory_space<vmem>>, vector<1x16x8xf32>,
    } else {
    }
    return
  }
  func.func @transform_0(%arg0: i32, %arg1: i32) -> (i32, i32, i32) {
    %c0_i32 = arith.constant 0 : i32
    %c0_i32_0 = arith.constant 0 : i32
    return %arg0, %arg1, %c0_i32 : i32, i32, i32
  }
  func.func @transform_1(%arg0: i32, %arg1: i32) -> (i32, i32) {
    %c0_i32 = arith.constant 0 : i32
    %c0_i32_0 = arith.constant 0 : i32
    %c0_i32_1 = arith.constant 0 : i32
    return %c0_i32, %c0_i32_0 : i32, i32
  }
  func.func @transform_2(%arg0: i32, %arg1: i32) -> (i32, i32) {
    %c0_i32 = arith.constant 0 : i32
    %c0_i32_0 = arith.constant 0 : i32
    %c0_i32_1 = arith.constant 0 : i32
    return %c0_i32, %c0_i32_0 : i32, i32
  }
  func.func @transform_3(%arg0: i32, %arg1: i32) -> (i32, i32) {
    %c0_i32 = arith.constant 0 : i32
    %c0_i32_0 = arith.constant 0 : i32
    %c0_i32_1 = arith.constant 0 : i32
    return %c0_i32, %c0_i32_0 : i32, i32
  }
  func.func @transform_4(%arg0: i32, %arg1: i32) -> (i32, i32) {
    %c0_i32 = arith.constant 0 : i32
    %c0_i32_0 = arith.constant 0 : i32
    %c0_i32_1 = arith.constant 0 : i32
    return %c0_i32, %c0_i32_0 : i32, i32
  }
  func.func @transform_5(%arg0: i32, %arg1: i32) -> (i32, i32, i32) {
    %c0_i32 = arith.constant 0 : i32
    %c0_i32_0 = arith.constant 0 : i32
    %c0_i32_1 = arith.constant 0 : i32
    return %arg0, %c0_i32, %c0_i32_0 : i32, i32, i32
  }
}

</mosaic_0001>

<bundles_post_ra>
// kernel: tpu_custom_call.1
= control target key start
LH: loop header
LB: loop body
LE: loop exit
PB: predicated region body
PF: predicated region fallthrough
CT: control target
= control target key end

     0   :  { %s1660_s18 = smov 0   ;;  %s1662_s19 = smov 0   ;;  %s1908_s0 = inlined_call_operand.vmem [shape: bf16[2,24,800], index: 0, kind: input, shape index: {}]   ;;  %s1909_s1 = inlined_call_operand.vmem [shape: bf16[800,32], index: 1, kind: input, shape index: {}]   ;;  %s1910_s2 = inlined_call_operand.vmem [shape: f32[1,32], index: 2, kind: input, shape index: {}]   ;;  %s1911_s3 = inlined_call_operand.vmem [shape: f32[16,8], index: 3, kind: input, shape index: {}]   ;;  %s1912_s4 = inlined_call_operand.vmem [shape: f32[1,8], index: 4, kind: input, shape index: {}]   ;;  %s1913_s5 = inlined_call_operand.vmem [shape: f32[2,16,8], index: 5, kind: output, shape index: {}]  }
   0x1   :  { %s1664_s20 = smov 0   ;;  %s1666_s21 = smov 0  }
   0x2   :  { %s1668_s22 = smov 0  }
   0x3 LB: > { %s24_s23 = sadd.s32 1, %s1615_s20  ;;  %s27_s24 = sadd.s32 1, %s1619_s21  ;;  %s1623_s22 = sphi %s1668_s22, %s15_s22   ;;  %s1619_s21 = sphi %s1666_s21, %s1917_s21   ;;  %s1615_s20 = sphi %s1664_s20, %s1916_s20   ;;  %s1611_s19 = sphi %s1662_s19, %s1915_s19   ;;  %s1607_s18 = sphi %s1660_s18, %s1914_s18  }
   0x4   : > { %p25_p0 = scmp.ge.s32.totalorder %s24_s23, 2  ;;  %p1288_p1 = scmp.ge.s32.totalorder %s1623_s22, 1 }
   0x5   : > { %p217_p2 = scmp.lt.s32.totalorder %s1623_s22, 5 }
   0x6   : > { %s1919_s23 = smov (%p25_p0, %s24_s23), 0  ;;  %s1921_s24 = smov (!%p25_p0, %s27_s24), %s1619_s21 }
   0x7   : > { %p218_p3 = pnand %p1288_p1, %p217_p2  ;;  %p29_p4 = scmp.ge.s32.totalorder %s1921_s24, 2 }
   0x8   : > { %s1289_s25 = sshll.u32 (!%p218_p3), %s1607_s18, 1  ;;  %p261_p5 = scmp.lt.s32.totalorder (!%p218_p3), %s1611_s19, 1 }
   0x9   : > { %s1923_s24 = smov (%p29_p4, %s1921_s24), 0  ;;  %221 = sbr.rel (%p218_p3) target bundleno = 795 (0x31b), region = 40 }
   0xa   : > { %p263_p6 = scmp.lt.s32.totalorder (!%p218_p3), %s1289_s25, 2  ;;  %p1293_p7 = scmp.ne.s32.totalorder (!%p218_p3), %s1607_s18, 0 }
  0x10   : > { %s1925_s19 = smov (!%p261_p5, %s1611_s19), 1  ;;  %s1927_s25 = smov (!%p263_p6, %s1289_s25), 2 }
  0x11   : > { %s1471_s26 = smul.u32 21, %s1925_s19  ;;  %s1362_s27 = sshll.u32 %s1925_s19, 4  ;;  %vm286_vm0 = vcmask (!%p1293_p7), 57344   ;;  %vm289_vm1 = vcmask (!%p1293_p7), 64512   ;;  %v1625_v0 = vmov (!%p1293_p7), -1e+30  }
  0x12   : > { %s1470_s28 = smul.u32 7, %s1927_s25  ;;  %s1696_s6 = scalar_lea.vmem %s1913_s5, %s1362_s27  ;;  %287 = vst.msk [vmem:[#allocation2] sm:$0x1] (!%p1293_p7), %vm286_vm0, %v1625_v0  ;;  %v1626_v1 = vmov (!%p1293_p7), 0.0  }
  0x13   : > { %285 = sbr.rel (%p1293_p7) target bundleno = 26 (0x1a), region = 44  ;;  %288 = vst.msk [vmem:[#allocation3] sm:$0x1] (!%p1293_p7), %vm286_vm0, %v1626_v1 }
  0x14   : > { %s267_s7 = sadd.s32 %s1471_s26, %s1470_s28  ;;  %290 = vst.msk [vmem:[#allocation4] sm:$0xff] (!%p1293_p7), %vm289_vm1, %v1626_v1  ;;  %291 = vst.msk [vmem:[#allocation4 + $0x8] sm:$0xff] (!%p1293_p7), %vm289_vm1, %v1626_v1 }
  0x15   : > { %s1290_s8 = sshll.u32 %s267_s7, 2 }
  0x16   : > { %s1701_s11 = scalar_lea.vmem %s1908_s0, %s1290_s8 }
  0x1a PF: > { %v1517_v2 = vld [vmem:[%s1909_s1 + $0x40] sm:$0xff]   ;;  %v1521_v6 = vld [vmem:[%s1909_s1 + $0x48] sm:$0xff]   ;;  %v1525_v10 = vld [vmem:[%s1909_s1 + $0x50] sm:$0xff]   ;;  %v1627_v40 = vmov 0.0   ;;  %vm1628_vm2 = vmmov 0   ;;  %vm742_vm3 = vcmask 261120  }
  0x1b   : > { %v1518_v3 = vld [vmem:[%s1909_s1] sm:$0xff]   ;;  %1363 = vmatprep.subr.bf16.mxu0 %v1517_v2  ;;  %v1522_v7 = vld [vmem:[%s1909_s1 + $0x8] sm:$0xff]   ;;  %v1526_v11 = vld [vmem:[%s1909_s1 + $0x10] sm:$0xff]   ;;  %vm919_vm4 = vcmask 130048   ;;  %s1629_s16 = smov 112   ;;  %vm1015_vm7 = vcmask 64512  }
  0x1c   : > { %v1519_v4 = vld [vmem:[%s1909_s1 + $0xc0] sm:$0xff]   ;;  %1364 = vmatpush3.bf16.msra.mxu0 %v1518_v3  ;;  %v1523_v8 = vld [vmem:[%s1909_s1 + $0xc8] sm:$0xff]   ;;  %v1527_v12 = vld [vmem:[%s1909_s1 + $0xd0] sm:$0xff]   ;;  %vm1053_vm8 = vcmask 57344   ;;  %p1359_p8 = scmp.ne.s32.totalorder %s1607_s18, 1 }
  0x1d   : > { %v1520_v5 = vld [vmem:[%s1909_s1 + $0x80] sm:$0xff]   ;;  %1385 = vmatprep.subr.bf16.mxu1 %v1519_v4  ;;  %1365 = vmatprep.subr.bf16.mxu0 %v1521_v6  ;;  %v1524_v9 = vld [vmem:[%s1909_s1 + $0x88] sm:$0xff]   ;;  %v1528_v13 = vld [vmem:[%s1909_s1 + $0x90] sm:$0xff]  }
  0x1e   : > { %1386 = vmatpush3.bf16.msra.mxu1 %v1520_v5  ;;  %v1529_v14 = vld [vmem:[%s1909_s1 + $0x58] sm:$0xff]   ;;  %v1533_v18 = vld [vmem:[%s1909_s1 + $0x60] sm:$0xff]   ;;  %v1537_v22 = vld [vmem:[%s1909_s1 + $0x68] sm:$0xff]  }
  0x1f   : > { %1387 = vmatprep.subr.bf16.mxu1 %v1523_v8  ;;  %v1530_v15 = vld [vmem:[%s1909_s1 + $0x18] sm:$0xff]   ;;  %v1534_v19 = vld [vmem:[%s1909_s1 + $0x20] sm:$0xff]   ;;  %v1538_v23 = vld [vmem:[%s1909_s1 + $0x28] sm:$0xff]  }
  0x20   : > { %1366 = vmatpush3.bf16.msra.mxu0 %v1522_v7  ;;  %v1531_v16 = vld [vmem:[%s1909_s1 + $0xd8] sm:$0xff]   ;;  %v1535_v20 = vld [vmem:[%s1909_s1 + $0xe0] sm:$0xff]   ;;  %v1539_v24 = vld [vmem:[%s1909_s1 + $0xe8] sm:$0xff]  }
  0x21   : > { %1367 = vmatprep.subr.bf16.mxu0 %v1525_v10  ;;  %v1532_v17 = vld [vmem:[%s1909_s1 + $0x98] sm:$0xff]   ;;  %v1536_v21 = vld [vmem:[%s1909_s1 + $0xa0] sm:$0xff]   ;;  %v1540_v25 = vld [vmem:[%s1909_s1 + $0xa8] sm:$0xff]  }
  0x22   : > { %1388 = vmatpush3.bf16.msra.mxu1 %v1524_v9  ;;  %v1541_v26 = vld [vmem:[%s1909_s1 + $0x70] sm:$0xff]   ;;  %v1545_v30 = vld [vmem:[%s1909_s1 + $0x78] sm:$0xff]   ;;  %v1550_v34 = vld [vmem:[%s1701_s11 + $0x4] ss:$28 sps:$4 sm:$0xff]  }
  0x23   : > { %1389 = vmatprep.subr.bf16.mxu1 %v1527_v12  ;;  %v1542_v27 = vld [vmem:[%s1909_s1 + $0x30] sm:$0xff]   ;;  %v1546_v31 = vld [vmem:[%s1909_s1 + $0x38] sm:$0xff]   ;;  %778 = vmatprep.mubr.bf16.mxu0 %v1550_v34  ;;  %v1552_v36 = vld [vmem:[%s1909_s1 + $0x140] sm:$0xff]  }
  0x24   : > { %1368 = vmatpush3.bf16.msra.mxu0 %v1526_v11  ;;  %v1543_v28 = vld [vmem:[%s1909_s1 + $0xf0] sm:$0xff]   ;;  %v1547_v32 = vld [vmem:[%s1909_s1 + $0xf8] sm:$0xff]   ;;  %v1553_v37 = vld [vmem:[%s1701_s11 + $0x8] ss:$28 sps:$4 sm:$0xff]  }
  0x25   : > { %1369 = vmatprep.subr.bf16.mxu0 %v1529_v14  ;;  %v1544_v29 = vld [vmem:[%s1909_s1 + $0xb0] sm:$0xff]   ;;  %v1548_v33 = vld [vmem:[%s1701_s11] ss:$28 sps:$4 sm:$0xff]   ;;  %v1555_v38 = vld [vmem:[%s1701_s11 + $0xc] ss:$28 sps:$4 sm:$0xff]  }
  0x26   : > { %1390 = vmatpush3.bf16.msra.mxu1 %v1528_v13  ;;  %v1551_v35 = vld [vmem:[%s1909_s1 + $0xb8] sm:$0xff]   ;;  %v1556_v39 = vld [vmem:[%s1909_s1 + $0x100] sm:$0xff]   ;;  %819 = vmatprep.mubr.bf16.mxu1 %v1555_v38  ;;  %v1557_v41 = vld [vmem:[%s1909_s1 + $0x148] sm:$0xff]  }
  0x27   : > { %1391 = vmatprep.subr.bf16.mxu1 %v1531_v16  ;;  %v1558_v42 = vld [vmem:[%s1909_s1 + $0x108] sm:$0xff]   ;;  %v1559_v43 = vld [vmem:[%s1909_s1 + $0x150] sm:$0xff]   ;;  %v1561_v45 = vld [vmem:[%s1909_s1 + $0x158] sm:$0xff]  }
  0x28   : > { %1370 = vmatpush3.bf16.msra.mxu0 %v1530_v15  ;;  %v1560_v44 = vld [vmem:[%s1909_s1 + $0x110] sm:$0xff]   ;;  %v1562_v46 = vld [vmem:[%s1909_s1 + $0x118] sm:$0xff]   ;;  %v1563_v47 = vld [vmem:[%s1909_s1 + $0x160] sm:$0xff]  }
  0x29   : > { %1371 = vmatprep.subr.bf16.mxu0 %v1533_v18  ;;  %v1569_v48 = vld [vmem:[%s1909_s1 + $0x180] sm:$0xff]   ;;  %v1565_v50 = vld [vmem:[%s1909_s1 + $0x168] sm:$0xff]   ;;  %v1574_v52 = vld [vmem:[%s1701_s11 + $0x14] ss:$28 sps:$4 sm:$0xff]  }
  0x2a   : > { %1392 = vmatpush3.bf16.msra.mxu1 %v1532_v17  ;;  %v1564_v49 = vld [vmem:[%s1909_s1 + $0x120] sm:$0xff]   ;;  %v1566_v51 = vld [vmem:[%s1909_s1 + $0x128] sm:$0xff]   ;;  %v1576_v54 = vld [vmem:[%s1701_s11 + $0x18] ss:$28 sps:$4 sm:$0xff]  }
  0x2b   : > { %1393 = vmatprep.subr.bf16.mxu1 %v1535_v20  ;;  %v1575_v53 = vld [vmem:[%s1909_s1 + $0x188] sm:$0xff]   ;;  %v1567_v55 = vld [vmem:[%s1909_s1 + $0x170] sm:$0xff]   ;;  %v1570_v57 = vld [vmem:[%s1909_s1 + $0x178] sm:$0xff]   ;;  %v1002_v20 = vlaneseq }
  0x2c   : > { %1372 = vmatpush3.bf16.msra.mxu0 %v1534_v19  ;;  %v1568_v56 = vld [vmem:[%s1909_s1 + $0x130] sm:$0xff]   ;;  %v1571_v58 = vld [vmem:[%s1909_s1 + $0x138] sm:$0xff]   ;;  %v910_v60 = vld [vmem:[%s1911_s3] sm:$0xff] }
  0x2d   : > { %1373 = vmatprep.subr.bf16.mxu0 %v1537_v22  ;;  %v1572_v59 = vld [vmem:[%s1701_s11 + $0x10] ss:$28 sps:$4 sm:$0xff]   ;;  %v1294_v0 = vld [vmem:[%s1910_s2] ss:$0 sm:$0xff]  ;;  %s1356_s11 = sshll.u32 %s1607_s18, 4 }
  0x2e   : > { %1394 = vmatpush3.bf16.msra.mxu1 %v1536_v21  ;;  %v911_v61 = vld [vmem:[%s1911_s3 + $0x8] sm:$0xff]  ;;  %v1003_v21 = vshrl.u32 %v1002_v20, 7  ;;  %v1005_v22 = vstv %s1356_s11 }
  0x2f   : > { %1395 = vmatprep.subr.bf16.mxu1 %v1539_v24  ;;  %v1462_v62 = vpack.c.bf16 %v911_v61, %v910_v60 }
  0x30   : > { %1374 = vmatpush3.bf16.msra.mxu0 %v1538_v23 }
  0x31   : > { %1375 = vmatprep.subr.bf16.mxu0 %v1541_v26  ;;  %v1004_v26 = vadd.s32 8, %v1003_v21 }
  0x32   : > { %1396 = vmatpush3.bf16.msra.mxu1 %v1540_v25  ;;  %v1006_v25 = vadd.s32 %v1005_v22, %v1003_v21 }
  0x33   : > { %1397 = vmatprep.subr.bf16.mxu1 %v1543_v28 }
  0x34   : > { %1376 = vmatpush3.bf16.msra.mxu0 %v1542_v27  ;;  %vm1008_vm5 = vcmp.lt.s32.totalorder %v1006_v25, 24 }
  0x35   : > { %1377 = vmatprep.subr.bf16.mxu0 %v1545_v30 }
  0x36   : > { %1398 = vmatpush3.bf16.msra.mxu1 %v1544_v29 }
  0x37   : > { %1399 = vmatprep.subr.bf16.mxu1 %v1547_v32  ;;  %v1007_v32 = vadd.s32 %v1005_v22, %v1004_v26  ;;  %v1055_v22 = vld [vmem:[#allocation4] sm:$0xff] }
  0x38   : > { %1378 = vmatpush3.bf16.msra.mxu0 %v1546_v31 }
  0x39   : > { %1407 = vmatprep.subr.bf16.mxu0 %v1552_v36  ;;  %vm1009_vm6 = vcmp.lt.s32.totalorder %v1007_v32, 24 }
  0x3a   : > { %1400 = vmatpush3.bf16.msra.mxu1 %v1551_v35 }
  0x3b   : > { %779 = vmatmul.mubr.bf16.vlgmr.msra.gmra.mrb[0].mxu0 %v1548_v33  ;;  %1440 = vmatprep.subr.bf16.mxu1 %v1627_v40 }
  0x3c   : > { %1408 = vmatpush3.bf16.msra.mxu0 %v1556_v39  ;;  %860 = vmatprep.mubr.bf16.mxu0 %v1574_v52 }
  0x3d   : > { %820 = vmatmul.mubr.bf16.vlgmr.msra.gmra.mrb[0].mxu1 %v1553_v37  ;;  %1409 = vmatprep.subr.bf16.mxu0 %v1557_v41 }
  0x3e   : > { %1444 = vmatprep.mubr.msk.bf16.mxu1 %vm1628_vm2, %v1627_v40  ;;  %1441 = vmatpush3.bf16.msra.mxu1 %v1569_v48 }
  0x3f   : > { %1442 = vmatprep.subr.bf16.mxu1 %v1627_v40  ;;  %v1353_v40 = vld [vmem:[%s1912_s4] ss:$0 sm:$0xff] }
  0x40   : > { %1410 = vmatpush3.bf16.msra.mxu0 %v1558_v42 }
  0x41   : > { %1411 = vmatprep.subr.bf16.mxu0 %v1559_v43 }
  0x42   : > { %1443 = vmatpush3.bf16.msra.mxu1 %v1575_v53 }
  0x43   : > { %1463 = vmatprep.subr.bf16.mxu1 %v1462_v62 }
  0x44   : > { %1412 = vmatpush3.bf16.msra.mxu0 %v1560_v44 }
  0x45   : > { %1413 = vmatprep.subr.bf16.mxu0 %v1561_v45  ;;  %1445 = vmatmul.mubr.msk.bf16.vlgmr.msra.gmra.mrb[4].mxu1 %vm742_vm3, %v1576_v54 }
  0x46   : > { %1465 = vmatpush3.bf16.msra.mxu1 %v1462_v62 }
  0x48   : > { %1414 = vmatpush3.bf16.msra.mxu0 %v1562_v46 }
  0x49   : > { %1415 = vmatprep.subr.bf16.mxu0 %v1563_v47 }
  0x4c   : > { %1416 = vmatpush3.bf16.msra.mxu0 %v1564_v49 }
  0x4d   : > { %1417 = vmatprep.subr.bf16.mxu0 %v1565_v50 }
  0x50   : > { %1418 = vmatpush3.bf16.msra.mxu0 %v1566_v51 }
  0x51   : > { %1419 = vmatprep.subr.bf16.mxu0 %v1567_v55  ;;  %v1014_v55 = vld [vmem:[#allocation2] sm:$0x1] }
  0x54   : > { %1420 = vmatpush3.bf16.msra.mxu0 %v1568_v56 }
  0x55   : > { %1421 = vmatprep.subr.bf16.mxu0 %v1570_v57  ;;  %v1032_v57 = vsub.s32 0, %v1003_v21  ;;  %v1056_v21 = vld [vmem:[#allocation4 + $0x8] sm:$0xff] }
  0x58   : > { %1422 = vmatpush3.bf16.msra.mxu0 %v1571_v58 }
  0x5b   : > { %861 = vmatmul.mubr.bf16.vlgmr.msra.gmra.mrb[4].mxu0 %v1572_v59 }
 0x10e   : > { %v1379_v63 = vpop.f32.mrb[0].mxu0 }
 0x10f   : > { %v1380_v1 = vpop.f32.mrb[1].mxu0 }
 0x110   : > { %v1381_v2 = vadd.f32 %v1380_v1, %v1379_v63  ;;  %v1382_v3 = vpop.f32.mrb[2].mxu0  ;;  %v1401_v4 = vpop.f32.mrb[0].mxu1 }
 0x111   : > { %v1383_v5 = vpop.f32.mrb[3].mxu0  ;;  %v1402_v8 = vpop.f32.mrb[1].mxu1 }
 0x112   : > { %v781_v6 = vadd.f32 %v1381_v2, %v1294_v0  ;;  %v1384_v7 = vadd.f32 %v1383_v5, %v1382_v3  ;;  %v1403_v9 = vadd.f32 %v1402_v8, %v1401_v4  ;;  %v1404_v10 = vpop.f32.mrb[2].mxu1 }
 0x113   : > { %v1405_v12 = vpop.f32.mrb[3].mxu1 }
 0x114   : > { %v784_v11 = vadd.f32 %v1384_v7, %v1294_v0  ;;  %v822_v13 = vadd.f32 %v1403_v9, %v781_v6  ;;  %v1406_v14 = vadd.f32 %v1405_v12, %v1404_v10 }
 0x116   : > { %v825_v15 = vadd.f32 %v1406_v14, %v784_v11 }
 0x118   : > { %v903_v16 = vpop.f32.mrb[4].mxu1 }
 0x119   : > { %v1446_v17 = vpop.f32.mrb[5].mxu1 }
 0x11a   : > { %v906_v18 = vpop.f32.mrb[6].mxu1 }
 0x11b   : > { %v1447_v19 = vpop.f32.mrb[7].mxu1 }
 0x12e   : > { %v1423_v23 = vpop.f32.mrb[4].mxu0 }
 0x12f   : > { %v1424_v24 = vpop.f32.mrb[5].mxu0 }
 0x130   : > { %v1425_v27 = vadd.f32 %v1424_v24, %v1423_v23  ;;  %v1426_v28 = vpop.f32.mrb[6].mxu0 }
 0x131   : > { %v1427_v29 = vpop.f32.mrb[7].mxu0 }
 0x132   : > { %v863_v30 = vadd.f32 %v1425_v27, %v822_v13  ;;  %v1428_v31 = vadd.f32 %v1427_v29, %v1426_v28 }
 0x134   : > { %v904_v33 = vadd.f32 %v903_v16, %v863_v30  ;;  %v866_v34 = vadd.f32 %v1428_v31, %v825_v15  ;;  %v1041_v16 = vld [vmem:[#allocation3] sm:$0x1] }
 0x136   : > { %v907_v35 = vadd.f32 %v906_v18, %v866_v34  ;;  %1452 = vmatprep.mubr.msk.f32.mxu1 %vm919_vm4, %v904_v33  ;;  %v1012_v36 = vsel %vm1008_vm5, %v904_v33, 0.0 }
 0x137   : > { %1067 = vrot.lane.b32.xlu0 %v1012_v36, %s1629_s16 }
 0x138   : > { %1453 = vmatmul.mubr.msk.f32.vlgmr.msra.gmra.mrb[8].mxu1 %vm919_vm4, %v907_v35  ;;  %v1013_v37 = vsel %vm1009_vm6, %v907_v35, 0.0 }
 0x13b   : > { %1069 = vrot.lane.b32.xlu0 %v1013_v37, %s1629_s16 }
 0x1a9   : > { %v1068_v38 = vpop.permute.xlu0 %1067 }
 0x1aa   : > { %1073 = vxpose.xlu1.b32.start [1/2] (short) (narrow) %v1068_v38, 16 }
 0x1ad   : > { %v1070_v39 = vpop.permute.xlu0 %1069 }
 0x1ae   : > { %1074 = vxpose.xlu1.b32.end [2/2] (short) (narrow) %v1070_v39, 16 }
 0x20b   : > { %v1454_v41 = vpop.f32.mrb[8].mxu1 }
 0x20c   : > { %v998_v42 = vadd.f32 %v1454_v41, %v1353_v40  ;;  %v992_v43 = vpop.f32.mrb[9].mxu1 }
 0x20d   : > { %v993_v44 = vadd.f32 %v1353_v40, %v992_v43 }
 0x20e   : > { %v1011_v45 = vsel %vm1009_vm6, %v998_v42, -1e+30 }
 0x20f   : > { %v1017_v46 = vsel %vm1015_vm7, %v1011_v45, -inf  ;;  %v1010_v47 = vsel %vm1008_vm5, %v993_v44, -1e+30 }
 0x210   : > { %v1016_v48 = vsel %vm1015_vm7, %v1010_v47, -inf }
 0x211   : > { %v1018_v49 = vmax.f32 %v1016_v48, %v1017_v46 }
 0x213   : > { %v1019_v50 = vrot.slane %v1018_v49, 4 }
 0x215   : > { %v1020_v51 = vmax.f32 %v1018_v49, %v1019_v50 }
 0x217   : > { %v1021_v52 = vrot.slane %v1020_v51, 2 }
 0x219   : > { %v1022_v53 = vmax.f32 %v1020_v51, %v1021_v52 }
 0x21b   : > { %v1023_v54 = vrot.slane %v1022_v53, 1 }
 0x21d   : > { %v1024_v56 = vmax.f32 %v1022_v53, %v1023_v54 }
 0x21f   : > { %v1025_v58 = vmax.f32 %v1014_v55, %v1024_v56 }
 0x221   : > { %v1026_v59 = vsub.f32 %v1014_v55, %v1025_v58  ;;  %v1033_v60 = vrot.slane %v1025_v58, %v1032_v57  ;;  %1190 = vst.msk [vmem:[#allocation2] sm:$0x1] %vm1053_vm8, %v1025_v58 }
 0x223   : > { %v1027_v61 = vmul.f32 1.442695, %v1026_v59  ;;  %v1035_v62 = vsub.f32 %v1010_v47, %v1033_v60  ;;  %v1036_v63 = vsub.f32 %v1011_v45, %v1033_v60 }
 0x225   : > { %v1037_v0 = vmul.f32 1.442695, %v1035_v62  ;;  %v1039_v1 = vmul.f32 1.442695, %v1036_v63  ;;  %1577 = vpow2.f32 %v1027_v61 }
 0x227   : > { %1579 = vpow2.f32 %v1037_v0 }
 0x228   : > { %1581 = vpow2.f32 %v1039_v1 }
 0x22a   : > { %v1089_v2 = vpop.trf.xlu1 }
 0x22b   : > { %1459 = vmatprep.mubr.msk.f32.mxu1 %vm919_vm4, %v1089_v2 }
 0x22e   : > { %v1090_v12 = vpop.trf.xlu1 }
 0x22f   : > { %v1578_v3 = vpop.eup %1577 }
 0x230   : > { %v1061_v4 = vrot.slane %v1578_v3, %v1032_v57  ;;  %v1042_v19 = vmul.f32 %v1578_v3, %v1041_v16 }
 0x231   : > { %v1580_v5 = vpop.eup %1579 }
 0x232   : > { %v1582_v6 = vpop.eup %1581  ;;  %v1043_v7 = vsel %vm1015_vm7, %v1580_v5, 0.0  ;;  %v1064_v23 = vmul.f32 %v1061_v4, %v1056_v21  ;;  %v1063_v25 = vmul.f32 %v1061_v4, %v1055_v22 }
 0x233   : > { %v1044_v8 = vsel %vm1015_vm7, %v1582_v6, 0.0  ;;  %v1466_v9 = vpack.c.bf16 %v1582_v6, %v1580_v5 }
 0x234   : > { %v1045_v10 = vadd.f32 %v1044_v8, %v1043_v7 }
 0x235   : > { %1467 = vmatprep.subr.bf16.mxu1 %v1466_v9 }
 0x236   : > { %v1046_v11 = vrot.slane %v1045_v10, 4  ;;  %1469 = vmatpush3.bf16.msra.mxu1 %v1466_v9 }
 0x238   : > { %v1047_v13 = vadd.f32 %v1046_v11, %v1045_v10 }
 0x239   : > { %1460 = vmatmul.mubr.msk.f32.vlgmr.msra.gmra.mrb[10].mxu1 %vm919_vm4, %v1090_v12 }
 0x23a   : > { %v1048_v14 = vrot.slane %v1047_v13, 2 }
 0x23c   : > { %v1049_v15 = vadd.f32 %v1048_v14, %v1047_v13 }
 0x23e   : > { %v1050_v17 = vrot.slane %v1049_v15, 1 }
 0x240   : > { %v1051_v18 = vadd.f32 %v1050_v17, %v1049_v15 }
 0x242   : > { %v1052_v20 = vadd.f32 %v1051_v18, %v1042_v19 }
 0x244   : > { %1054 = vst.msk [vmem:[#allocation3] sm:$0x1] %vm1053_vm8, %v1052_v20 }
 0x24b   : > { %v1195_v29 = vld [vmem:[#allocation3] sm:$0x1] (!%p1359_p8) }
 0x24c   : > { %1583 = vrcp.f32 (!%p1359_p8), %v1195_v29 }
 0x256   : > { %v1584_v30 = vpop.eup (!%p1359_p8), %1583 }
 0x257   : > { %v1203_v33 = vrot.slane (!%p1359_p8), %v1584_v30, %v1032_v57 }
 0x30a   : > { %1194 = sbr.rel (%p1359_p8) target bundleno = 795 (0x31b), region = 48 }
 0x30c   : > { %v1461_v24 = vpop.f32.mrb[10].mxu1 }
 0x30d   : > { %v1187_v26 = vadd.f32 %v1461_v24, %v1064_v23  ;;  %v1177_v27 = vpop.f32.mrb[11].mxu1 }
 0x30e   : > { %v1186_v28 = vadd.f32 %v1177_v27, %v1063_v25 }
 0x30f   : > { %1189 = vst.msk [vmem:[#allocation4 + $0x8] sm:$0xff] %vm1015_vm7, %v1187_v26 }
 0x310   : > { %1188 = vst.msk [vmem:[#allocation4] sm:$0xff] %vm1015_vm7, %v1186_v28 }
 0x316   : > { %v1198_v32 = vld [vmem:[#allocation4 + $0x8] sm:$0xff] }
 0x317   : > { %v1197_v31 = vld [vmem:[#allocation4] sm:$0xff]  ;;  %v1206_v35 = vmul.f32 %v1203_v33, %v1198_v32 }
 0x318   : > { %v1205_v34 = vmul.f32 %v1203_v33, %v1197_v31 }
 0x319   : > { %1208 = vst.msk [vmem:[%s1696_s6 + $0x8] sm:$0xff] %vm1015_vm7, %v1206_v35 }
 0x31a   : > { %1207 = vst.msk [vmem:[%s1696_s6] sm:$0xff] %vm1015_vm7, %v1205_v34 }
 0x31b PF: > { %s15_s22 = sadd.s32 1, %s1623_s22   ;;  %s1914_s18 = smov %s1615_s20 }
 0x31c   : > { %p12_p9 = scmp.ge.s32.totalorder %s15_s22, 6   ;;  %s1915_s19 = smov %s1619_s21 }
 0x31d   : > { %s1916_s20 = smov %s1919_s23  ;;  %s1917_s21 = smov %s1923_s24 }
 0x31e   :  { %14 = sbr.rel (!%p12_p9) target bundleno = 3 (0x3), region = 78 }

</bundles_post_ra>
